<compile_context>
chip_gen: v6e
topology: v6e:2x2x1
jax: 0.10.0
libtpu: 0.0.40
codegen_flags: <defaults>
</compile_context>

<pallas_src>
import functools
import math

import jax
import jax.numpy as jnp
from jax.experimental import pallas as pl
from jax.experimental.pallas import tpu as pltpu

LN_EPS = 1e-5              # F.layer_norm default eps
L2_EPS_SQ = 1e-24          # F.normalize eps=1e-12, squared (vs sum-of-squares)
ATTN_SCALE = 8.0           # Attention(scale=8)
MASK_VALUE = -1e30         # large finite sentinel; same softmax as -finfo.max


def _round_up(n, m):
    return ((n + m - 1) // m) * m


def _mem_config():
    """Generation-aware (vmem_limit_bytes, ff_row_tile_cap)."""
    phys = 64 * 1024 * 1024
    try:
        info = pltpu.get_tpu_info()
        phys = getattr(info, "vmem_capacity_bytes", None) or phys
    except Exception:
        pass
    if phys >= 128 * 1024 * 1024:          # v5e / v6e: plenty of VMEM
        return 96 * 1024 * 1024, 1024
    return 32 * 1024 * 1024, 256           # v7x (64 MiB) or unknown: headroom


# ---------------------------------------------------------------------------
# In-kernel math helpers (VPU / XLU / EUP)
# ---------------------------------------------------------------------------
def _layer_norm(x, gamma):
    # F.layer_norm over last dim, learned gamma, beta buffer == 0
    mu = jnp.mean(x, axis=-1, keepdims=True)
    var = jnp.mean((x - mu) ** 2, axis=-1, keepdims=True)
    return (x - mu) * jax.lax.rsqrt(var + LN_EPS) * gamma


def _layer_norm_count(x, gamma, n_true):
    # LayerNorm over a lane-padded last dim: padded columns are exactly zero,
    # so plain sums divided by the TRUE count give exact statistics.
    mu = jnp.sum(x, axis=-1, keepdims=True) / n_true
    var = jnp.sum(x * x, axis=-1, keepdims=True) / n_true - mu * mu
    var = jnp.maximum(var, 0.0)
    return (x - mu) * jax.lax.rsqrt(var + LN_EPS) * gamma


def _l2norm(x):
    # F.normalize(dim=-1) == x * rsqrt(max(sum(x^2), eps^2))
    ss = jnp.sum(x * x, axis=-1, keepdims=True)
    return x * jax.lax.rsqrt(jnp.maximum(ss, L2_EPS_SQ))


def _erf(x):
    # Abramowitz & Stegun 7.1.26, |err| < 1.5e-7 (~f32 precision).
    p = 0.3275911
    a1, a2, a3, a4, a5 = (0.254829592, -0.284496736, 1.421413741,
                          -1.453152027, 1.061405429)
    s = jnp.sign(x)
    ax = jnp.abs(x)
    t = 1.0 / (1.0 + p * ax)
    poly = ((((a5 * t + a4) * t + a3) * t + a2) * t + a1) * t
    return s * (1.0 - poly * jnp.exp(-(ax * ax)))


def _gelu_exact(x):
    # PyTorch F.gelu default (erf-based)
    return 0.5 * x * (1.0 + _erf(x * 0.7071067811865476))


# ---------------------------------------------------------------------------
# Attention: one grid step = one batch element, ALL heads in-kernel.
# ---------------------------------------------------------------------------
def _attn_core(x, kv_b, bias, gamma, wq, wk, wv, nkn, nv, qs_scaled, ks, wo,
               *, heads, dim_head):
    """x: (N, D) f32.  kv_b: (M, D) bf16 or None (None => self-attn, kv = LN(x)).
    Returns the to_out projection (N, D) f32 (residual NOT included)."""
    xn = _layer_norm(x, gamma)             # computed once for all heads
    xb = xn.astype(jnp.bfloat16)
    kvb = xb if kv_b is None else kv_b     # cross-attn kv is NOT normed

    # Wide projections: full-width MXU tiles over all heads at once.
    q = jnp.dot(xb, wq, preferred_element_type=jnp.float32)    # (N, H*Dh)
    k = jnp.dot(kvb, wk, preferred_element_type=jnp.float32)   # (M, H*Dh)
    v = jnp.dot(kvb, wv, preferred_element_type=jnp.float32)   # (M, H*Dh)

    head_outs = []
    for h in range(heads):                 # short static unroll
        sl = slice(h * dim_head, (h + 1) * dim_head)
        qh = _l2norm(q[:, sl]) * qs_scaled      # attn scale folded into q_scale
        kh = _l2norm(k[:, sl]) * ks
        vh = v[:, sl]
        sim = jax.lax.dot_general(
            qh.astype(jnp.bfloat16), kh.astype(jnp.bfloat16),
            (((1,), (1,)), ((), ())), preferred_element_type=jnp.float32)  # (N, M)
        if bias is not None:
            sim = sim + bias                    # (1, M) additive mask bias
        sim_n = jnp.sum(qh * nkn[h], axis=-1, keepdims=True)   # null key, (N, 1)
        m = jnp.maximum(jnp.max(sim, axis=-1, keepdims=True), sim_n)
        p = jnp.exp(sim - m)
        p_n = jnp.exp(sim_n - m)
        inv = pl.reciprocal(jnp.sum(p, axis=-1, keepdims=True) + p_n,
                            approx=False)       # exact (parity with reference)
        pv = jnp.dot(p.astype(jnp.bfloat16), vh.astype(jnp.bfloat16),
                     preferred_element_type=jnp.float32)        # (N, Dh)
        head_outs.append((pv + p_n * nv[h]) * inv)

    out_cat = jnp.concatenate(head_outs, axis=-1).astype(jnp.bfloat16)  # (N, H*Dh)
    return jnp.dot(out_cat, wo, preferred_element_type=jnp.float32)     # (N, D)


def _self_attn_kernel(x_ref, gamma_ref, wq_ref, wk_ref, wv_ref, nkn_ref,
                      nv_ref, qs_ref, ks_ref, wo_ref, o_ref, *, heads,
                      dim_head):
    x = x_ref[0]
    contrib = _attn_core(x, None, None, gamma_ref[...], wq_ref[...],
                         wk_ref[...], wv_ref[...], nkn_ref[...], nv_ref[...],
                         qs_ref[...], ks_ref[...], wo_ref[...],
                         heads=heads, dim_head=dim_head)
    o_ref[0] = x + contrib


def _cross_attn_kernel(x_ref, ctx_ref, bias_ref, gamma_ref, wq_ref, wk_ref,
                       wv_ref, nkn_ref, nv_ref, qs_ref, ks_ref, wo_ref, o_ref,
                       *, heads, dim_head):
    x = x_ref[0]
    contrib = _attn_core(x, ctx_ref[0], bias_ref[0], gamma_ref[...],
                         wq_ref[...], wk_ref[...], wv_ref[...], nkn_ref[...],
                         nv_ref[...], qs_ref[...], ks_ref[...], wo_ref[...],
                         heads=heads, dim_head=dim_head)
    o_ref[0] = x + contrib


def attention_block(x3, p, *, vmem_limit, ctx_b=None, bias=None):
    B, N, D = x3.shape
    heads, _, dim_head = p["nv"].shape
    HD = heads * dim_head
    cross = ctx_b is not None

    batch3 = lambda b: (b, 0, 0)
    const2 = lambda b: (0, 0)
    const3 = lambda b: (0, 0, 0)

    in_specs = [pl.BlockSpec((1, N, D), batch3)]          # x (residual + LN input)
    args = [x3]
    if cross:
        M = ctx_b.shape[1]
        in_specs += [pl.BlockSpec((1, M, D), batch3),     # context, pre-cast bf16
                     pl.BlockSpec((1, 1, M), batch3)]     # precomputed mask bias f32
        args += [ctx_b, bias]
    in_specs += [
        pl.BlockSpec((1, D), const2),                     # LN gamma
        pl.BlockSpec((D, HD), const2),                    # wq (all heads, wide)
        pl.BlockSpec((D, HD), const2),                    # wk
        pl.BlockSpec((D, HD), const2),                    # wv
        pl.BlockSpec((heads, 1, dim_head), const3),       # l2norm(null_k)*k_scale
        pl.BlockSpec((heads, 1, dim_head), const3),       # null v
        pl.BlockSpec((1, dim_head), const2),              # q_scale * attn_scale
        pl.BlockSpec((1, dim_head), const2),              # k_scale
        pl.BlockSpec((HD, D), const2),                    # wo (all heads)
    ]
    args += [p["gamma"], p["wq"], p["wk"], p["wv"], p["nkn"], p["nv"],
             p["qs_scaled"], p["ks"], p["wo"]]

    kernel = functools.partial(
        _cross_attn_kernel if cross else _self_attn_kernel,
        heads=heads, dim_head=dim_head)

    return pl.pallas_call(
        kernel,
        out_shape=jax.ShapeDtypeStruct((B, N, D), jnp.float32),
        grid=(B,),
        in_specs=in_specs,
        out_specs=pl.BlockSpec((1, N, D), batch3),
        input_output_aliases={0: 0},
        compiler_params=pltpu.CompilerParams(
            dimension_semantics=("parallel",),
            vmem_limit_bytes=vmem_limit),
    )(*args)


# ---------------------------------------------------------------------------
# FeedForward: LN -> (value, gate) Linears -> GEGLU -> LN(inner) -> Linear + res
# (last-layer variant also applies the final TransformerBlocks LayerNorm)
# ---------------------------------------------------------------------------
def _ff_core(x, g1, w1a, w1b, g2, w2, inner_true):
    xn = _layer_norm(x, g1).astype(jnp.bfloat16)
    val = jnp.dot(xn, w1a, preferred_element_type=jnp.float32)   # GEGLU value half
    gate = jnp.dot(xn, w1b, preferred_element_type=jnp.float32)  # GEGLU gate half
    h = _layer_norm_count(gate * _gelu_exact(val), g2, inner_true)
    return jnp.dot(h.astype(jnp.bfloat16), w2,
                   preferred_element_type=jnp.float32) + x       # residual


def _ff_kernel(x_ref, g1_ref, w1a_ref, w1b_ref, g2_ref, w2_ref, o_ref, *,
               inner_true):
    o_ref[...] = _ff_core(x_ref[...], g1_ref[...], w1a_ref[...], w1b_ref[...],
                          g2_ref[...], w2_ref[...], inner_true)


def _ff_final_kernel(x_ref, g1_ref, w1a_ref, w1b_ref, g2_ref, w2_ref, gf_ref,
                     o_ref, *, inner_true):
    y = _ff_core(x_ref[...], g1_ref[...], w1a_ref[...], w1b_ref[...],
                 g2_ref[...], w2_ref[...], inner_true)
    o_ref[...] = _layer_norm(y, gf_ref[...])    # fused final LayerNorm


def ff_block(x3, p, *, row_cap, vmem_limit, final_gamma=None):
    B, N, D = x3.shape
    BN = B * N
    inner_p = p["w2"].shape[0]
    x2 = x3.reshape(BN, D)

    TR = min(row_cap, _round_up(BN, 8))         # row tile, multiple of 8
    BNp = _round_up(BN, TR)                      # pad rows instead of giant tile
    if BNp != BN:
        x2 = jnp.pad(x2, ((0, BNp - BN), (0, 0)))

    row = lambda i: (i, 0)
    const = lambda i: (0, 0)
    in_specs = [
        pl.BlockSpec((TR, D), row),              # activations (row tile)
        pl.BlockSpec((1, D), const),             # LN1 gamma
        pl.BlockSpec((D, inner_p), const),       # w1 value half (resident)
        pl.BlockSpec((D, inner_p), const),       # w1 gate half (resident)
        pl.BlockSpec((1, inner_p), const),       # LN2 gamma (padded cols = 0)
        pl.BlockSpec((inner_p, D), const),       # w2 (padded rows = 0)
    ]
    args = [x2, p["g1"], p["w1a"], p["w1b"], p["g2"], p["w2"]]
    if final_gamma is not None:
        in_specs.append(pl.BlockSpec((1, D), const))
        args.append(final_gamma)
        kernel = functools.partial(_ff_final_kernel, inner_true=p["inner_true"])
    else:
        kernel = functools.partial(_ff_kernel, inner_true=p["inner_true"])

    out2 = pl.pallas_call(
        kernel,
        out_shape=jax.ShapeDtypeStruct((BNp, D), jnp.float32),
        grid=(BNp // TR,),
        in_specs=in_specs,
        out_specs=pl.BlockSpec((TR, D), row),
        input_output_aliases={0: 0},
        compiler_params=pltpu.CompilerParams(
            dimension_semantics=("parallel",),
            vmem_limit_bytes=vmem_limit),
    )(*args)
    if BNp != BN:
        out2 = out2[:BN]
    return out2.reshape(B, N, D)


# ---------------------------------------------------------------------------
# Standalone final LayerNorm (only used if depth == 0)
# ---------------------------------------------------------------------------
def _ln_kernel(x_ref, g_ref, o_ref):
    o_ref[...] = _layer_norm(x_ref[...], g_ref[...])


def final_norm(x3, gamma, vmem_limit):
    B, N, D = x3.shape
    return pl.pallas_call(
        _ln_kernel,
        out_shape=jax.ShapeDtypeStruct((B, N, D), jnp.float32),
        grid=(B,),
        in_specs=[pl.BlockSpec((1, N, D), lambda b: (b, 0, 0)),
                  pl.BlockSpec((1, D), lambda b: (0, 0))],
        out_specs=pl.BlockSpec((1, N, D), lambda b: (b, 0, 0)),
        input_output_aliases={0: 0},
        compiler_params=pltpu.CompilerParams(
            dimension_semantics=("parallel",),
            vmem_limit_bytes=vmem_limit),
    )(x3, gamma)


# ---------------------------------------------------------------------------
# Full TransformerBlocks forward
# ---------------------------------------------------------------------------
def transformer_blocks(x, context, context_mask, params):
    B, N, D = x.shape
    M = context.shape[1]
    vmem_limit, row_cap = _mem_config()

    # x-independent precompute, reused by every layer (review item):
    ctx_b = context.astype(jnp.bfloat16)                        # halve ctx DMA
    if context_mask is None:
        bias = jnp.zeros((B, 1, M), jnp.float32)
    else:
        bias = jnp.where(context_mask.reshape(B, 1, M), 0.0,
                         MASK_VALUE).astype(jnp.float32)

    layers = params["layers"]
    if not layers:
        return final_norm(x, params["norm_gamma"], vmem_limit)

    for li, layer in enumerate(layers):
        x = attention_block(x, layer["attn"], vmem_limit=vmem_limit)            # self-attn + res
        x = attention_block(x, layer["cross"], vmem_limit=vmem_limit,
                            ctx_b=ctx_b, bias=bias)                              # cross-attn + res
        last = li == len(layers) - 1
        x = ff_block(x, layer["ff"], row_cap=row_cap, vmem_limit=vmem_limit,
                     final_gamma=params["norm_gamma"] if last else None)         # FF + res (+ final LN)
    return x


# ---------------------------------------------------------------------------
# Deterministic parameter init (shapes per the module's __init__).
# Matmul weights stored bf16; x-independent folds done here (review item).
# ---------------------------------------------------------------------------
def init_params(key, *, dim, depth, dim_head, heads, ff_mult):
    HD = dim_head * heads
    inner = int(dim * ff_mult * 2 / 3)
    # Lane-dense padding of the GEGLU inner dim (256 multiple unless already
    # 128-aligned): unmasked vst + full MXU tiles; padded params are zero.
    inner_p = inner if inner % 128 == 0 else _round_up(inner, 256)

    def linear(k, fan_in, shape):
        bound = 1.0 / math.sqrt(fan_in)              # torch nn.Linear default
        return jax.random.uniform(k, shape, jnp.float32, -bound, bound)

    def attn_params(k):
        kk = jax.random.split(k, 6)
        qs = jnp.ones((1, dim_head), jnp.float32)
        ks = jnp.ones((1, dim_head), jnp.float32)
        nk = jax.random.normal(kk[4], (heads, 1, dim_head), jnp.float32)
        # null key is l2-normed and k-scaled exactly as in forward; fold here.
        nkn = nk * jax.lax.rsqrt(
            jnp.maximum(jnp.sum(nk * nk, axis=-1, keepdims=True), L2_EPS_SQ)) * ks
        return dict(
            gamma=jnp.ones((1, dim), jnp.float32),
            wq=linear(kk[0], dim, (dim, HD)).astype(jnp.bfloat16),
            wk=linear(kk[1], dim, (dim, HD)).astype(jnp.bfloat16),
            wv=linear(kk[2], dim, (dim, HD)).astype(jnp.bfloat16),
            wo=linear(kk[3], HD, (HD, dim)).astype(jnp.bfloat16),
            nkn=nkn,
            nv=jax.random.normal(kk[5], (heads, 1, dim_head), jnp.float32),
            qs_scaled=qs * ATTN_SCALE,                # attn scale folded into q
            ks=ks,
        )

    def ff_params(k):
        k1, k2, k3 = jax.random.split(k, 3)
        w1a = linear(k1, dim, (dim, inner))           # GEGLU value half
        w1b = linear(k2, dim, (dim, inner))           # GEGLU gate half
        w2 = linear(k3, inner, (inner, dim))
        g2 = jnp.ones((1, inner), jnp.float32)
        pad = inner_p - inner
        if pad:
            w1a = jnp.pad(w1a, ((0, 0), (0, pad)))
            w1b = jnp.pad(w1b, ((0, 0), (0, pad)))
            w2 = jnp.pad(w2, ((0, pad), (0, 0)))
            g2 = jnp.pad(g2, ((0, 0), (0, pad)))
        return dict(
            g1=jnp.ones((1, dim), jnp.float32),
            w1a=w1a.astype(jnp.bfloat16),
            w1b=w1b.astype(jnp.bfloat16),
            g2=g2,
            w2=w2.astype(jnp.bfloat16),
            inner_true=inner,                          # true inner for LN stats
        )

    layers = []
    for i in range(depth):
        ka, kc, kf = jax.random.split(jax.random.fold_in(key, i), 3)
        layers.append(dict(attn=attn_params(ka), cross=attn_params(kc),
                           ff=ff_params(kf)))
    return dict(layers=layers, norm_gamma=jnp.ones((1, dim), jnp.float32))


if __name__ == "__main__":
    key = jax.random.PRNGKey(0)
    B, N, M = 2, 8, 6
    dim, depth, dim_head, heads, ff_mult = 48, 2, 16, 2, 4

    k1, k2, k3 = jax.random.split(key, 3)
    x = jax.random.normal(k1, (B, N, dim), jnp.float32)
    context = jax.random.normal(k2, (B, M, dim), jnp.float32)
    # ragged context lengths: batch0 keeps all 6 tokens, batch1 keeps 4
    context_mask = jnp.arange(M)[None, :] < jnp.array([[6], [4]])   # (B, M) bool

    params = init_params(k3, dim=dim, depth=depth, dim_head=dim_head,
                         heads=heads, ff_mult=ff_mult)

    out = transformer_blocks(x, context, context_mask, params)
    out = jax.block_until_ready(out)
    assert out.shape == (B, N, dim)
    assert bool(jnp.all(jnp.isfinite(out)))
    print("KERNEL_OK")
</pallas_src>

<mosaic_0001>
module attributes {stable_mosaic.version = 11 : i64} {
  func.func @_self_attn_kernel(%arg0: i32, %arg1: memref<1x8x48xf32, #tpu.memory_space<vmem>>, %arg2: memref<1x48xf32, #tpu.memory_space<vmem>>, %arg3: memref<48x32xbf16, #tpu.memory_space<vmem>>, %arg4: memref<48x32xbf16, #tpu.memory_space<vmem>>, %arg5: memref<48x32xbf16, #tpu.memory_space<vmem>>, %arg6: memref<2x1x16xf32, #tpu.memory_space<vmem>>, %arg7: memref<2x1x16xf32, #tpu.memory_space<vmem>>, %arg8: memref<1x16xf32, #tpu.memory_space<vmem>>, %arg9: memref<1x16xf32, #tpu.memory_space<vmem>>, %arg10: memref<32x48xbf16, #tpu.memory_space<vmem>>, %arg11: memref<1x8x48xf32, #tpu.memory_space<vmem>>) attributes {dimension_semantics = [#tpu.dimension_semantics<parallel>], iteration_bounds = array<i64: 2>, scalar_prefetch = 0 : i64, scratch_operands = 0 : i64, tpu.core_type = #tpu.core_type<tc>, window_params = [{transform_indices = @transform_0, window_bounds = array<i64: 1, 8, 48>}, {pipeline_mode = #tpu.pipeline_mode<synchronous>, transform_indices = @transform_1, window_bounds = array<i64: 1, 48>}, {pipeline_mode = #tpu.pipeline_mode<synchronous>, transform_indices = @transform_2, window_bounds = array<i64: 48, 32>}, {pipeline_mode = #tpu.pipeline_mode<synchronous>, transform_indices = @transform_3, window_bounds = array<i64: 48, 32>}, {pipeline_mode = #tpu.pipeline_mode<synchronous>, transform_indices = @transform_4, window_bounds = array<i64: 48, 32>}, {pipeline_mode = #tpu.pipeline_mode<synchronous>, transform_indices = @transform_5, window_bounds = array<i64: 2, 1, 16>}, {pipeline_mode = #tpu.pipeline_mode<synchronous>, transform_indices = @transform_6, window_bounds = array<i64: 2, 1, 16>}, {pipeline_mode = #tpu.pipeline_mode<synchronous>, transform_indices = @transform_7, window_bounds = array<i64: 1, 16>}, {pipeline_mode = #tpu.pipeline_mode<synchronous>, transform_indices = @transform_8, window_bounds = array<i64: 1, 16>}, {pipeline_mode = #tpu.pipeline_mode<synchronous>, transform_indices = @transform_9, window_bounds = array<i64: 32, 48>}, {transform_indices = @transform_10, window_bounds = array<i64: 1, 8, 48>}]} {
    %c0 = arith.constant 0 : index
    %c0_0 = arith.constant 0 : index
    %c0_1 = arith.constant 0 : index
    %0 = vector.load %arg1[%c0, %c0_0, %c0_1] : memref<1x8x48xf32, #tpu.memory_space<vmem>>, vector<1x8x48xf32>
    %1 = vector.shape_cast %0 : vector<1x8x48xf32> to vector<8x48xf32>
    %c0_2 = arith.constant 0 : index
    %c0_3 = arith.constant 0 : index
    %2 = vector.load %arg2[%c0_2, %c0_3] : memref<1x48xf32, #tpu.memory_space<vmem>>, vector<1x48xf32>
    %c0_4 = arith.constant 0 : index
    %c0_5 = arith.constant 0 : index
    %3 = vector.load %arg3[%c0_4, %c0_5] : memref<48x32xbf16, #tpu.memory_space<vmem>>, vector<48x32xbf16>
    %c0_6 = arith.constant 0 : index
    %c0_7 = arith.constant 0 : index
    %4 = vector.load %arg4[%c0_6, %c0_7] : memref<48x32xbf16, #tpu.memory_space<vmem>>, vector<48x32xbf16>
    %c0_8 = arith.constant 0 : index
    %c0_9 = arith.constant 0 : index
    %5 = vector.load %arg5[%c0_8, %c0_9] : memref<48x32xbf16, #tpu.memory_space<vmem>>, vector<48x32xbf16>
    %c0_10 = arith.constant 0 : index
    %c0_11 = arith.constant 0 : index
    %c0_12 = arith.constant 0 : index
    %6 = vector.load %arg6[%c0_10, %c0_11, %c0_12] : memref<2x1x16xf32, #tpu.memory_space<vmem>>, vector<2x1x16xf32>
    %c0_13 = arith.constant 0 : index
    %c0_14 = arith.constant 0 : index
    %c0_15 = arith.constant 0 : index
    %7 = vector.load %arg7[%c0_13, %c0_14, %c0_15] : memref<2x1x16xf32, #tpu.memory_space<vmem>>, vector<2x1x16xf32>
    %c0_16 = arith.constant 0 : index
    %c0_17 = arith.constant 0 : index
    %8 = vector.load %arg8[%c0_16, %c0_17] : memref<1x16xf32, #tpu.memory_space<vmem>>, vector<1x16xf32>
    %c0_18 = arith.constant 0 : index
    %c0_19 = arith.constant 0 : index
    %9 = vector.load %arg9[%c0_18, %c0_19] : memref<1x16xf32, #tpu.memory_space<vmem>>, vector<1x16xf32>
    %c0_20 = arith.constant 0 : index
    %c0_21 = arith.constant 0 : index
    %10 = vector.load %arg10[%c0_20, %c0_21] : memref<32x48xbf16, #tpu.memory_space<vmem>>, vector<32x48xbf16>
    %cst = arith.constant dense<0.000000e+00> : vector<8xf32>
    %11 = vector.multi_reduction <add>, %1, %cst [1] : vector<8x48xf32> to vector<8xf32>
    %12 = vector.shape_cast %11 : vector<8xf32> to vector<8x1xf32>
    %cst_22 = arith.constant 4.800000e+01 : f32
    %13 = vector.broadcast %cst_22 : f32 to vector<8x1xf32>
    %14 = arith.divf %12, %13 : vector<8x1xf32>
    %15 = vector.broadcast %14 : vector<8x1xf32> to vector<8x48xf32>
    %16 = arith.subf %1, %15 : vector<8x48xf32>
    %17 = arith.mulf %16, %16 : vector<8x48xf32>
    %cst_23 = arith.constant dense<0.000000e+00> : vector<8xf32>
    %18 = vector.multi_reduction <add>, %17, %cst_23 [1] : vector<8x48xf32> to vector<8xf32>
    %19 = vector.shape_cast %18 : vector<8xf32> to vector<8x1xf32>
    %cst_24 = arith.constant 4.800000e+01 : f32
    %20 = vector.broadcast %cst_24 : f32 to vector<8x1xf32>
    %21 = arith.divf %19, %20 : vector<8x1xf32>
    %22 = vector.broadcast %14 : vector<8x1xf32> to vector<8x48xf32>
    %23 = arith.subf %1, %22 : vector<8x48xf32>
    %cst_25 = arith.constant 9.99999974E-6 : f32
    %24 = vector.broadcast %cst_25 : f32 to vector<8x1xf32>
    %25 = arith.addf %21, %24 : vector<8x1xf32>
    %26 = math.rsqrt %25 : vector<8x1xf32>
    %27 = vector.broadcast %26 : vector<8x1xf32> to vector<8x48xf32>
    %28 = arith.mulf %23, %27 : vector<8x48xf32>
    %29 = vector.broadcast %2 : vector<1x48xf32> to vector<8x48xf32>
    %30 = arith.mulf %28, %29 : vector<8x48xf32>
    %31 = arith.truncf %30 : vector<8x48xf32> to vector<8x48xbf16>
    %cst_26 = arith.constant dense<0.000000e+00> : vector<8x32xf32>
    %32 = tpu.matmul %31, %3, %cst_26 {dimension_numbers = #tpu.dot_dimension_numbers<[1], [0], [0], [1], [0, 0, 1, 1], [], []>} : vector<8x48xbf16>, vector<48x32xbf16>, vector<8x32xf32> -> vector<8x32xf32>
    %cst_27 = arith.constant dense<0.000000e+00> : vector<8x32xf32>
    %33 = tpu.matmul %31, %4, %cst_27 {dimension_numbers = #tpu.dot_dimension_numbers<[1], [0], [0], [1], [0, 0, 1, 1], [], []>} : vector<8x48xbf16>, vector<48x32xbf16>, vector<8x32xf32> -> vector<8x32xf32>
    %cst_28 = arith.constant dense<0.000000e+00> : vector<8x32xf32>
    %34 = tpu.matmul %31, %5, %cst_28 {dimension_numbers = #tpu.dot_dimension_numbers<[1], [0], [0], [1], [0, 0, 1, 1], [], []>} : vector<8x48xbf16>, vector<48x32xbf16>, vector<8x32xf32> -> vector<8x32xf32>
    %35 = vector.extract_strided_slice %32 {offsets = [0, 0], sizes = [8, 16], strides = [1, 1]} : vector<8x32xf32> to vector<8x16xf32>
    %36 = arith.mulf %35, %35 : vector<8x16xf32>
    %cst_29 = arith.constant dense<0.000000e+00> : vector<8xf32>
    %37 = vector.multi_reduction <add>, %36, %cst_29 [1] : vector<8x16xf32> to vector<8xf32>
    %38 = vector.shape_cast %37 : vector<8xf32> to vector<8x1xf32>
    %cst_30 = arith.constant 1.000000e-24 : f32
    %39 = vector.broadcast %cst_30 : f32 to vector<8x1xf32>
    %40 = arith.maximumf %38, %39 : vector<8x1xf32>
    %41 = math.rsqrt %40 : vector<8x1xf32>
    %42 = vector.broadcast %41 : vector<8x1xf32> to vector<8x16xf32>
    %43 = arith.mulf %35, %42 : vector<8x16xf32>
    %44 = vector.broadcast %8 : vector<1x16xf32> to vector<8x16xf32>
    %45 = arith.mulf %43, %44 : vector<8x16xf32>
    %46 = vector.extract_strided_slice %33 {offsets = [0, 0], sizes = [8, 16], strides = [1, 1]} : vector<8x32xf32> to vector<8x16xf32>
    %47 = arith.mulf %46, %46 : vector<8x16xf32>
    %cst_31 = arith.constant dense<0.000000e+00> : vector<8xf32>
    %48 = vector.multi_reduction <add>, %47, %cst_31 [1] : vector<8x16xf32> to vector<8xf32>
    %49 = vector.shape_cast %48 : vector<8xf32> to vector<8x1xf32>
    %cst_32 = arith.constant 1.000000e-24 : f32
    %50 = vector.broadcast %cst_32 : f32 to vector<8x1xf32>
    %51 = arith.maximumf %49, %50 : vector<8x1xf32>
    %52 = math.rsqrt %51 : vector<8x1xf32>
    %53 = vector.broadcast %52 : vector<8x1xf32> to vector<8x16xf32>
    %54 = arith.mulf %46, %53 : vector<8x16xf32>
    %55 = vector.broadcast %9 : vector<1x16xf32> to vector<8x16xf32>
    %56 = arith.mulf %54, %55 : vector<8x16xf32>
    %57 = vector.extract_strided_slice %34 {offsets = [0, 0], sizes = [8, 16], strides = [1, 1]} : vector<8x32xf32> to vector<8x16xf32>
    %58 = arith.truncf %45 : vector<8x16xf32> to vector<8x16xbf16>
    %59 = arith.truncf %56 : vector<8x16xf32> to vector<8x16xbf16>
    %cst_33 = arith.constant dense<0.000000e+00> : vector<8x8xf32>
    %60 = tpu.matmul %58, %59, %cst_33 {dimension_numbers = #tpu.dot_dimension_numbers<[1], [1], [0], [0], [0, 0, 1, 0], [], []>} : vector<8x16xbf16>, vector<8x16xbf16>, vector<8x8xf32> -> vector<8x8xf32>
    %61 = vector.extract_strided_slice %6 {offsets = [0, 0, 0], sizes = [1, 1, 16], strides = [1, 1, 1]} : vector<2x1x16xf32> to vector<1x1x16xf32>
    %62 = vector.shape_cast %61 : vector<1x1x16xf32> to vector<1x16xf32>
    %63 = vector.broadcast %62 : vector<1x16xf32> to vector<8x16xf32>
    %64 = arith.mulf %45, %63 : vector<8x16xf32>
    %cst_34 = arith.constant dense<0.000000e+00> : vector<8xf32>
    %65 = vector.multi_reduction <add>, %64, %cst_34 [1] : vector<8x16xf32> to vector<8xf32>
    %66 = vector.shape_cast %65 : vector<8xf32> to vector<8x1xf32>
    %cst_35 = arith.constant dense<0xFF800000> : vector<8xf32>
    %67 = vector.multi_reduction <maximumf>, %60, %cst_35 [1] : vector<8x8xf32> to vector<8xf32>
    %68 = vector.shape_cast %67 : vector<8xf32> to vector<8x1xf32>
    %69 = arith.maximumf %68, %66 : vector<8x1xf32>
    %70 = vector.broadcast %69 : vector<8x1xf32> to vector<8x8xf32>
    %71 = arith.subf %60, %70 : vector<8x8xf32>
    %72 = math.exp %71 : vector<8x8xf32>
    %73 = arith.subf %66, %69 : vector<8x1xf32>
    %74 = math.exp %73 : vector<8x1xf32>
    %cst_36 = arith.constant dense<0.000000e+00> : vector<8xf32>
    %75 = vector.multi_reduction <add>, %72, %cst_36 [1] : vector<8x8xf32> to vector<8xf32>
    %76 = vector.shape_cast %75 : vector<8xf32> to vector<8x1xf32>
    %77 = arith.addf %76, %74 : vector<8x1xf32>
    %78 = tpu.reciprocal %77 : vector<8x1xf32> -> vector<8x1xf32>
    %79 = arith.truncf %72 : vector<8x8xf32> to vector<8x8xbf16>
    %80 = arith.truncf %57 : vector<8x16xf32> to vector<8x16xbf16>
    %cst_37 = arith.constant dense<0.000000e+00> : vector<8x16xf32>
    %81 = tpu.matmul %79, %80, %cst_37 {dimension_numbers = #tpu.dot_dimension_numbers<[1], [0], [0], [1], [0, 0, 1, 1], [], []>} : vector<8x8xbf16>, vector<8x16xbf16>, vector<8x16xf32> -> vector<8x16xf32>
    %82 = vector.extract_strided_slice %7 {offsets = [0, 0, 0], sizes = [1, 1, 16], strides = [1, 1, 1]} : vector<2x1x16xf32> to vector<1x1x16xf32>
    %83 = vector.shape_cast %82 : vector<1x1x16xf32> to vector<1x16xf32>
    %84 = vector.broadcast %74 : vector<8x1xf32> to vector<8x16xf32>
    %85 = vector.broadcast %83 : vector<1x16xf32> to vector<8x16xf32>
    %86 = arith.mulf %84, %85 : vector<8x16xf32>
    %87 = arith.addf %81, %86 : vector<8x16xf32>
    %88 = vector.broadcast %78 : vector<8x1xf32> to vector<8x16xf32>
    %89 = arith.mulf %87, %88 : vector<8x16xf32>
    %90 = vector.extract_strided_slice %32 {offsets = [0, 16], sizes = [8, 16], strides = [1, 1]} : vector<8x32xf32> to vector<8x16xf32>
    %91 = arith.mulf %90, %90 : vector<8x16xf32>
    %cst_38 = arith.constant dense<0.000000e+00> : vector<8xf32>
    %92 = vector.multi_reduction <add>, %91, %cst_38 [1] : vector<8x16xf32> to vector<8xf32>
    %93 = vector.shape_cast %92 : vector<8xf32> to vector<8x1xf32>
    %cst_39 = arith.constant 1.000000e-24 : f32
    %94 = vector.broadcast %cst_39 : f32 to vector<8x1xf32>
    %95 = arith.maximumf %93, %94 : vector<8x1xf32>
    %96 = math.rsqrt %95 : vector<8x1xf32>
    %97 = vector.broadcast %96 : vector<8x1xf32> to vector<8x16xf32>
    %98 = arith.mulf %90, %97 : vector<8x16xf32>
    %99 = vector.broadcast %8 : vector<1x16xf32> to vector<8x16xf32>
    %100 = arith.mulf %98, %99 : vector<8x16xf32>
    %101 = vector.extract_strided_slice %33 {offsets = [0, 16], sizes = [8, 16], strides = [1, 1]} : vector<8x32xf32> to vector<8x16xf32>
    %102 = arith.mulf %101, %101 : vector<8x16xf32>
    %cst_40 = arith.constant dense<0.000000e+00> : vector<8xf32>
    %103 = vector.multi_reduction <add>, %102, %cst_40 [1] : vector<8x16xf32> to vector<8xf32>
    %104 = vector.shape_cast %103 : vector<8xf32> to vector<8x1xf32>
    %cst_41 = arith.constant 1.000000e-24 : f32
    %105 = vector.broadcast %cst_41 : f32 to vector<8x1xf32>
    %106 = arith.maximumf %104, %105 : vector<8x1xf32>
    %107 = math.rsqrt %106 : vector<8x1xf32>
    %108 = vector.broadcast %107 : vector<8x1xf32> to vector<8x16xf32>
    %109 = arith.mulf %101, %108 : vector<8x16xf32>
    %110 = vector.broadcast %9 : vector<1x16xf32> to vector<8x16xf32>
    %111 = arith.mulf %109, %110 : vector<8x16xf32>
    %112 = vector.extract_strided_slice %34 {offsets = [0, 16], sizes = [8, 16], strides = [1, 1]} : vector<8x32xf32> to vector<8x16xf32>
    %113 = arith.truncf %100 : vector<8x16xf32> to vector<8x16xbf16>
    %114 = arith.truncf %111 : vector<8x16xf32> to vector<8x16xbf16>
    %cst_42 = arith.constant dense<0.000000e+00> : vector<8x8xf32>
    %115 = tpu.matmul %113, %114, %cst_42 {dimension_numbers = #tpu.dot_dimension_numbers<[1], [1], [0], [0], [0, 0, 1, 0], [], []>} : vector<8x16xbf16>, vector<8x16xbf16>, vector<8x8xf32> -> vector<8x8xf32>
    %116 = vector.extract_strided_slice %6 {offsets = [1, 0, 0], sizes = [1, 1, 16], strides = [1, 1, 1]} : vector<2x1x16xf32> to vector<1x1x16xf32>
    %117 = vector.shape_cast %116 : vector<1x1x16xf32> to vector<1x16xf32>
    %118 = vector.broadcast %117 : vector<1x16xf32> to vector<8x16xf32>
    %119 = arith.mulf %100, %118 : vector<8x16xf32>
    %cst_43 = arith.constant dense<0.000000e+00> : vector<8xf32>
    %120 = vector.multi_reduction <add>, %119, %cst_43 [1] : vector<8x16xf32> to vector<8xf32>
    %121 = vector.shape_cast %120 : vector<8xf32> to vector<8x1xf32>
    %cst_44 = arith.constant dense<0xFF800000> : vector<8xf32>
    %122 = vector.multi_reduction <maximumf>, %115, %cst_44 [1] : vector<8x8xf32> to vector<8xf32>
    %123 = vector.shape_cast %122 : vector<8xf32> to vector<8x1xf32>
    %124 = arith.maximumf %123, %121 : vector<8x1xf32>
    %125 = vector.broadcast %124 : vector<8x1xf32> to vector<8x8xf32>
    %126 = arith.subf %115, %125 : vector<8x8xf32>
    %127 = math.exp %126 : vector<8x8xf32>
    %128 = arith.subf %121, %124 : vector<8x1xf32>
    %129 = math.exp %128 : vector<8x1xf32>
    %cst_45 = arith.constant dense<0.000000e+00> : vector<8xf32>
    %130 = vector.multi_reduction <add>, %127, %cst_45 [1] : vector<8x8xf32> to vector<8xf32>
    %131 = vector.shape_cast %130 : vector<8xf32> to vector<8x1xf32>
    %132 = arith.addf %131, %129 : vector<8x1xf32>
    %133 = tpu.reciprocal %132 : vector<8x1xf32> -> vector<8x1xf32>
    %134 = arith.truncf %127 : vector<8x8xf32> to vector<8x8xbf16>
    %135 = arith.truncf %112 : vector<8x16xf32> to vector<8x16xbf16>
    %cst_46 = arith.constant dense<0.000000e+00> : vector<8x16xf32>
    %136 = tpu.matmul %134, %135, %cst_46 {dimension_numbers = #tpu.dot_dimension_numbers<[1], [0], [0], [1], [0, 0, 1, 1], [], []>} : vector<8x8xbf16>, vector<8x16xbf16>, vector<8x16xf32> -> vector<8x16xf32>
    %137 = vector.extract_strided_slice %7 {offsets = [1, 0, 0], sizes = [1, 1, 16], strides = [1, 1, 1]} : vector<2x1x16xf32> to vector<1x1x16xf32>
    %138 = vector.shape_cast %137 : vector<1x1x16xf32> to vector<1x16xf32>
    %139 = vector.broadcast %129 : vector<8x1xf32> to vector<8x16xf32>
    %140 = vector.broadcast %138 : vector<1x16xf32> to vector<8x16xf32>
    %141 = arith.mulf %139, %140 : vector<8x16xf32>
    %142 = arith.addf %136, %141 : vector<8x16xf32>
    %143 = vector.broadcast %133 : vector<8x1xf32> to vector<8x16xf32>
    %144 = arith.mulf %142, %143 : vector<8x16xf32>
    %145 = tpu.concatenate %89, %144 in 1 : vector<8x16xf32>, vector<8x16xf32> -> vector<8x32xf32>
    %146 = arith.truncf %145 : vector<8x32xf32> to vector<8x32xbf16>
    %cst_47 = arith.constant dense<0.000000e+00> : vector<8x48xf32>
    %147 = tpu.matmul %146, %10, %cst_47 {dimension_numbers = #tpu.dot_dimension_numbers<[1], [0], [0], [1], [0, 0, 1, 1], [], []>} : vector<8x32xbf16>, vector<32x48xbf16>, vector<8x48xf32> -> vector<8x48xf32>
    %148 = arith.addf %1, %147 : vector<8x48xf32>
    %c0_48 = arith.constant 0 : index
    %c0_49 = arith.constant 0 : index
    %c0_50 = arith.constant 0 : index
    %149 = vector.load %arg11[%c0_48, %c0_49, %c0_50] : memref<1x8x48xf32, #tpu.memory_space<vmem>>, vector<1x8x48xf32>
    %150 = vector.shape_cast %149 : vector<1x8x48xf32> to vector<8x48xf32>
    %151 = vector.shape_cast %148 : vector<8x48xf32> to vector<1x8x48xf32>
    tpu.vector_store %arg11[%c0_48, %c0_49, %c0_50], %151 {strides = array<i32>} : memref<1x8x48xf32, #tpu.memory_space<vmem>>, vector<1x8x48xf32>,
    return
  }
  func.func @transform_0(%arg0: i32) -> (i32, i32, i32) {
    %c0_i32 = arith.constant 0 : i32
    %c0_i32_0 = arith.constant 0 : i32
    %c0_i32_1 = arith.constant 0 : i32
    return %arg0, %c0_i32, %c0_i32_0 : i32, i32, i32
  }
  func.func @transform_1(%arg0: i32) -> (i32, i32) {
    %c0_i32 = arith.constant 0 : i32
    %c0_i32_0 = arith.constant 0 : i32
    %c0_i32_1 = arith.constant 0 : i32
    return %c0_i32, %c0_i32_0 : i32, i32
  }
  func.func @transform_2(%arg0: i32) -> (i32, i32) {
    %c0_i32 = arith.constant 0 : i32
    %c0_i32_0 = arith.constant 0 : i32
    %c0_i32_1 = arith.constant 0 : i32
    return %c0_i32, %c0_i32_0 : i32, i32
  }
  func.func @transform_3(%arg0: i32) -> (i32, i32) {
    %c0_i32 = arith.constant 0 : i32
    %c0_i32_0 = arith.constant 0 : i32
    %c0_i32_1 = arith.constant 0 : i32
    return %c0_i32, %c0_i32_0 : i32, i32
  }
  func.func @transform_4(%arg0: i32) -> (i32, i32) {
    %c0_i32 = arith.constant 0 : i32
    %c0_i32_0 = arith.constant 0 : i32
    %c0_i32_1 = arith.constant 0 : i32
    return %c0_i32, %c0_i32_0 : i32, i32
  }
  func.func @transform_5(%arg0: i32) -> (i32, i32, i32) {
    %c0_i32 = arith.constant 0 : i32
    %c0_i32_0 = arith.constant 0 : i32
    %c0_i32_1 = arith.constant 0 : i32
    %c0_i32_2 = arith.constant 0 : i32
    return %c0_i32, %c0_i32_0, %c0_i32_1 : i32, i32, i32
  }
  func.func @transform_6(%arg0: i32) -> (i32, i32, i32) {
    %c0_i32 = arith.constant 0 : i32
    %c0_i32_0 = arith.constant 0 : i32
    %c0_i32_1 = arith.constant 0 : i32
    %c0_i32_2 = arith.constant 0 : i32
    return %c0_i32, %c0_i32_0, %c0_i32_1 : i32, i32, i32
  }
  func.func @transform_7(%arg0: i32) -> (i32, i32) {
    %c0_i32 = arith.constant 0 : i32
    %c0_i32_0 = arith.constant 0 : i32
    %c0_i32_1 = arith.constant 0 : i32
    return %c0_i32, %c0_i32_0 : i32, i32
  }
  func.func @transform_8(%arg0: i32) -> (i32, i32) {
    %c0_i32 = arith.constant 0 : i32
    %c0_i32_0 = arith.constant 0 : i32
    %c0_i32_1 = arith.constant 0 : i32
    return %c0_i32, %c0_i32_0 : i32, i32
  }
  func.func @transform_9(%arg0: i32) -> (i32, i32) {
    %c0_i32 = arith.constant 0 : i32
    %c0_i32_0 = arith.constant 0 : i32
    %c0_i32_1 = arith.constant 0 : i32
    return %c0_i32, %c0_i32_0 : i32, i32
  }
  func.func @transform_10(%arg0: i32) -> (i32, i32, i32) {
    %c0_i32 = arith.constant 0 : i32
    %c0_i32_0 = arith.constant 0 : i32
    %c0_i32_1 = arith.constant 0 : i32
    return %arg0, %c0_i32, %c0_i32_0 : i32, i32, i32
  }
}

</mosaic_0001>

<bundles_post_ra>
// kernel: tpu_custom_call.1
= control target key start
LH: loop header
LB: loop body
LE: loop exit
PB: predicated region body
PF: predicated region fallthrough
CT: control target
= control target key end

     0   :  { %15 = vsyncpa [#allocation3], 0  ;;  %s1734_s0 = inlined_call_operand.hbm [shape: f32[2,8,48], index: 0, kind: input, shape index: {}, may-alias: {0,10}]   ;;  %s1735_s1 = inlined_call_operand.vmem [shape: f32[1,48], index: 1, kind: input, shape index: {}]   ;;  %s1736_s2 = inlined_call_operand.vmem [shape: bf16[48,32], index: 2, kind: input, shape index: {}]   ;;  %s1737_s3 = inlined_call_operand.vmem [shape: bf16[48,32], index: 3, kind: input, shape index: {}]   ;;  %s1738_s4 = inlined_call_operand.vmem [shape: bf16[48,32], index: 4, kind: input, shape index: {}]   ;;  %s1739_s5 = inlined_call_operand.vmem [shape: f32[2,1,16], index: 5, kind: input, shape index: {}]   ;;  %s1740_s6 = inlined_call_operand.vmem [shape: f32[2,1,16], index: 6, kind: input, shape index: {}]   ;;  %s1741_s7 = inlined_call_operand.vmem [shape: f32[1,16], index: 7, kind: input, shape index: {}]   ;;  %s1742_s8 = inlined_call_operand.vmem [shape: f32[1,16], index: 8, kind: input, shape index: {}]   ;;  %s1743_s9 = inlined_call_operand.vmem [shape: bf16[32,48], index: 9, kind: input, shape index: {}]   ;;  %s1744_s10 = inlined_call_operand.hbm [shape: f32[2,8,48], index: 10, kind: output, shape index: {}, may-alias: {0,10}]  }
   0x1   :  { %17 = vsyncpa [#allocation3 + $0x1], 0 }
   0x2   :  { %18 = vsyncpa [#allocation4], 0 }
   0x3   :  { %20 = vsyncpa [#allocation4 + $0x1], 0  ;;  %s1446_s13 = smov 0   ;;  %s1448_s14 = smov 0  }
   0x4   :  { %s1450_s15 = smov 0   ;;  %s1452_s16 = smov 0  }
   0x5 LB: > { %1750 = sst [smem:[#allocation8_spill]] %s1379_s15  ;;  %s1467_s17 = sadd.s32 4294967295, %s1383_s16   ;;  %s1383_s16 = sphi %s1452_s16, %s1764_s16   ;;  %s1379_s15 = sphi %s1450_s15, %s1766_s15   ;;  %s1375_s14 = sphi %s1448_s14, %s1768_s14   ;;  %s1371_s13 = sphi %s1446_s13, %s1767_s13  }
   0x6   : > { %s1085_s18 = sadd.s32 4294967294, %s1383_s16   ;;  %s1471_s19 = sadd.s32 1, %s1383_s16  }
   0x7   : > { %1751 = sst [smem:[#allocation9_spill]] %s1471_s19  ;;  %s33_s20 = sadd.s32 1, %s1379_s15 }
   0x8   : > { %s30_s21 = ssub.s32 %s1383_s16, %s1471_s19  ;;  %p40_p0 = scmp.ne.s32.totalorder %s1379_s15, %s1375_s14 }
   0x9   : > { %p31_p1 = scmp.eq.s32.totalorder %s30_s21, 0  ;;  %p41_p2 = scmp.eq.s32.totalorder %s1383_s16, 0 }
   0xa   : > { %p46_p3 = scmp.ne.s32.totalorder %s1375_s14, %s1371_s13  ;;  %p47_p4 = scmp.eq.s32.totalorder %s1467_s17, 0 }
   0xb   : > { %s1483_s22 = scalar_select %p31_p1, %s1379_s15, %s33_s20  }
   0xc   : > { %p1485_p5 = por %p41_p2, %p40_p0  ;;  %p1489_p6 = por %p47_p4, %p46_p3 }
   0xd   : > { %1752 = sst [smem:[#allocation10_spill]] %s1483_s22  ;;  %p259_p7 = scmp.eq.s32.totalorder %s1467_s17, 1 }
   0xe   : > { %s1754_s24 = scalar_select %p1489_p6, 1, 0 }
   0xf   : > { %p265_p8 = scmp.eq.s32.totalorder %s1085_s18, 1  ;;  %p1220_p10 = scmp.lt.s32.totalorder %s1383_s16, 2 }
  0x10   : > { %p1496_p11 = por %p259_p7, %p40_p0  ;;  %s312_s27 = sand.u32 1, %s1379_s15  }
  0x11   : > { %p1500_p12 = por %p265_p8, %p46_p3  ;;  %s1089_s28 = sshll.u32 %s1383_s16, 7 }
  0x12   : > { %s1755_s25 = scalar_select %p1496_p11, 1, 0 }
  0x13   : > { %s1756_s26 = scalar_select %p1500_p12, 1, 0 }
  0x14   : > { %s1088_s29 = sshll.u32 %s312_s27, 3  ;;  %s1509_s12 = scalar_lea.hbm %s1734_s0, %s1089_s28 }
  0x15   : > { %s316_s18 = scalar_lea.vmem [#allocation2], %s1088_s29  ;;  %p1513_p13 = pnand %p1220_p10, %p1485_p5 }
  0x16   : > { %s323_s20 = sshll.u32 %s316_s18, 4  ;;  %s313_s22 = scalar_lea.sflag [#allocation3], %s312_s27  ;;  %s1517_s20 = int_to_ptr.vmem [resolvable:$true] %s323_s20 }
  0x17   : > { %s1291_s15 = scalar_lea.hbm %s1509_s12, 128  ;;  %p1293_p3 = pneg %p1513_p13 }
  0x18   : > { %p1292_p2 = scmp.ne.s32.totalorder %s1509_s12, %s1291_s15  ;;  %s1296_s23 = scalar_lea.hbm %s1734_s0, 256 }
  0x19   : > { %p1297_p5 = scmp.lt.s32.totalorder %s1509_s12, %s1734_s0  ;;  %p1298_p8 = scmp.lt.s32.totalorder %s1296_s23, %s1291_s15 }
  0x1a   : > { %p1294_p4 = pnand %p1293_p3, %p1292_p2 }
  0x1b   : > { %p1299_p10 = por %p1298_p8, %p1297_p5 }
  0x1c   : > { %p1295_p7 = pneg %p1294_p4 }
  0x1e   : > { %p1300_p9 = pnand %p1299_p10, %p1295_p7 }
  0x20   : > { %1303 = shalt.err (!%p1300_p9)
}
  0x21   : > { %s1304_s27 = scalar_lea.vmem %s1517_s20, 128  ;;  %s1385_s18 = smov [#allocation2]  }
  0x22   : > { %p1305_p0 = scmp.ne.s32.totalorder %s1517_s20, %s1304_s27  ;;  %s1309_s19 = sshll.u32 %s1385_s18, 4  ;;  %s1310_s19 = int_to_ptr.vmem [resolvable:$false] %s1309_s19 }
  0x23   : > { %s1311_s28 = scalar_lea.vmem %s1310_s19, 256  ;;  %p1312_p4 = scmp.lt.s32.totalorder %s1517_s20, %s1310_s19 }
  0x24   : > { %p1307_p1 = pnand %p1305_p0, %p1293_p3  ;;  %p1313_p12 = scmp.lt.s32.totalorder %s1311_s28, %s1304_s27 }
  0x26   : > { %p1308_p2 = pneg %p1307_p1  ;;  %p1314_p11 = por %p1313_p12, %p1312_p4 }
  0x28   : > { %p1315_p6 = pnand %p1314_p11, %p1308_p2 }
  0x2a   : > { %1318 = shalt.err (!%p1315_p6)
}
  0x2b   : > { %1215 = dma.hbm_to_vmem [thread:$0]  (!%p1513_p13), %s1509_s12, 128, %s1517_s20, %s313_s22  }
  0x2c   : > { %p1758_p9 = scmp.lt.s32.totalorder %s1383_s16, 3  ;;  %p1759_p7 = scmp.ge.s32.totalorder %s1383_s16, 1 }
  0x2e   : > { %p329_p0 = pnand %p1759_p7, %p1758_p9 }
  0x2f   : > { %s1544_s15 = sand.u32 (!%p329_p0), 1, %s1375_s14   ;;  %p1760_p6 = scmp.ne.s32.totalorder (!%p329_p0), %s1754_s24, 0 }
  0x30   : > { %332 = sbr.rel (%p329_p0) target bundleno = 1835 (0x72b), region = 60  ;;  %s1091_s19 = sshll.u32 (!%p329_p0), %s1544_s15, 3 }
  0x31   : > { %s335_s29 = scalar_lea.sflag (!%p329_p0), [#allocation3], %s1544_s15  ;;  %s338_s21 = scalar_lea.vmem (!%p329_p0), [#allocation2], %s1091_s19 }
  0x35   : > { %1362 = dma.done.wait (%p1760_p6), %s335_s29, 128  }
  0x36   : > { %1364 = vsyncadd (%p1760_p6), %s335_s29, 4294967168  ;;  %vm406_vm0 = vcmask 392192   ;;  %v1554_v0 = vld [vmem:[%s338_s21] sm:$0xff]  ;;  %v1258_v7 = vld [vmem:[%s1736_s2 + $0x10] sm:$0xff]   ;;  %v1386_v9 = vmov 0.0   ;;  %vm1387_vm1 = vmmov 0  }
  0x37   : > { %v407_v1 = vsel %vm406_vm0, %v1554_v0, 0.0  ;;  %v1259_v8 = vld [vmem:[%s1737_s3 + $0x10] sm:$0xff]   ;;  %1146 = vmatprep.subr.bf16.mxu0 %v1386_v9  ;;  %1156 = vmatprep.subr.bf16.mxu1 %v1386_v9  ;;  %v1260_v10 = vld [vmem:[%s1736_s2 + $0x8] sm:$0xff]   ;;  %v1262_v12 = vld [vmem:[%s1736_s2] sm:$0xff]   ;;  %s1388_s18 = smov 112   ;;  %vm607_vm2 = vcmask 130048  }
  0x38   : > { %408 = vadd.xlane.f32.xlu0 %v407_v1  ;;  %1147 = vmatpush3.bf16.msra.mxu0 %v1258_v7  ;;  %v1261_v11 = vld [vmem:[%s1737_s3 + $0x8] sm:$0xff]   ;;  %v1263_v13 = vld [vmem:[%s1737_s3] sm:$0xff]   ;;  %v1264_v21 = vld [vmem:[%s1738_s4 + $0x10] sm:$0xff]   ;;  %s1389_s21 = smov 16   ;;  %vm721_vm3 = vcmask 1043456   ;;  %vm693_vm4 = vcmask 64512  }
  0x39   : > { %1157 = vmatpush3.bf16.msra.mxu1 %v1259_v8  ;;  %1148 = vmatprep.subr.bf16.mxu0 %v1386_v9  ;;  %v1093_v18 = vld [vmem:[%s1735_s1] ss:$0 sm:$0xff]  ;;  %v1265_v23 = vld [vmem:[%s1738_s4 + $0x8] sm:$0xff]   ;;  %v1113_v47 = vld [vmem:[%s1739_s5 + $0x1] ss:$0 sm:$0xff]  ;;  %vm955_vm5 = vcmask 261120  }
  0x3a   : > { %1158 = vmatprep.subr.bf16.mxu1 %v1386_v9  ;;  %1152 = vmatprep.mubr.msk.bf16.mxu0 %vm1387_vm1, %v1386_v9  ;;  %v1266_v24 = vld [vmem:[%s1738_s4] sm:$0xff]   ;;  %s1120_s20 = sshll.u32 %s1467_s17, 7  ;;  %s374_s23 = scalar_lea.vmem [#allocation5], %s1091_s19 }
  0x3b   : > { %1162 = vmatprep.mubr.msk.bf16.mxu1 %vm1387_vm1, %v1386_v9  ;;  %v1107_v44 = vld [vmem:[%s1742_s8] ss:$0 sm:$0xff]  ;;  %s1015_s30 = sshll.u32 %s374_s23, 4  ;;  %s1002_s17 = scalar_lea.sflag [#allocation4], %s1544_s15  ;;  %s1692_s30 = int_to_ptr.vmem [resolvable:$true] %s1015_s30 }
  0x3c   : > { %1149 = vmatpush3.bf16.msra.mxu0 %v1260_v10  ;;  %v1106_v45 = vld [vmem:[%s1741_s7] ss:$0 sm:$0xff]  ;;  %s1319_s19 = scalar_lea.vmem %s1692_s30, 128  ;;  %p1761_p12 = scmp.ne.s32.totalorder %s1755_s25, 0 }
  0x3d   : > { %1159 = vmatpush3.bf16.msra.mxu1 %v1261_v11  ;;  %1150 = vmatprep.subr.bf16.mxu0 %v1386_v9  ;;  %p1320_p11 = scmp.ne.s32.totalorder %s1692_s30, %s1319_s19 }
  0x3e   : > { %1160 = vmatprep.subr.bf16.mxu1 %v1386_v9 }
  0x3f   : > { %p1321_p13 = pnand %p1320_p11, %p1761_p12 }
  0x40   : > { %1151 = vmatpush3.bf16.msra.mxu0 %v1262_v12 }
  0x41   : > { %1161 = vmatpush3.bf16.msra.mxu1 %v1263_v13  ;;  %1166 = vmatprep.subr.bf16.mxu0 %v1386_v9  ;;  %p1322_p1 = pneg %p1321_p13 }
  0x42   : > { %1176 = vmatprep.subr.bf16.mxu1 %v1386_v9 }
  0xc1   : > { %v409_v2 = vpop.xlane.xlu0 %408 }
  0xc2   : > { %v411_v3 = vmul.f32 0.020833334, %v409_v2 }
  0xc4   : > { %v412_v4 = vsub.f32 %v1554_v0, %v411_v3 }
  0xc6   : > { %v413_v5 = vmul.f32 %v412_v4, %v412_v4 }
  0xc8   : > { %v414_v6 = vsel %vm406_vm0, %v413_v5, 0.0 }
  0xc9   : > { %415 = vadd.xlane.f32.xlu0 %v414_v6 }
 0x152   : > { %v416_v14 = vpop.xlane.xlu0 %415 }
 0x153   : > { %v417_v15 = vmul.f32 0.020833334, %v416_v14 }
 0x155   : > { %v418_v16 = vadd.f32 1e-05, %v417_v15 }
 0x157   : > { %1269 = vrsqrt.f32 %v418_v16 }
 0x164   : > { %v1270_v17 = vpop.eup %1269 }
 0x165   : > { %v420_v19 = vmul.f32 %v1270_v17, %v412_v4  ;;  %v1109_v17 = vld [vmem:[%s1739_s5] ss:$0 sm:$0xff] }
 0x167   : > { %v427_v20 = vmul.f32 %v1093_v18, %v420_v19 }
 0x169   : > { %v428_v22 = vpack.c.bf16 %v427_v20, %v427_v20 }
 0x16b   : > { %1153 = vmatmul.mubr.msk.bf16.vlgmr.msra.gmra.mxu0 %vm406_vm0, %v428_v22  ;;  %1163 = vmatmul.mubr.msk.bf16.vlgmr.msra.gmra.mxu1 %vm406_vm0, %v428_v22 }
 0x16c   : > { %1167 = vmatpush3.bf16.msra.mxu0 %v1264_v21  ;;  %1172 = vmatprep.mubr.msk.bf16.mxu0 %vm1387_vm1, %v1386_v9 }
 0x16d   : > { %1168 = vmatprep.subr.bf16.mxu0 %v1386_v9  ;;  %1178 = vmatprep.mubr.msk.bf16.mxu1 %vm1387_vm1, %v1386_v9 }
 0x170   : > { %1169 = vmatpush3.bf16.msra.mxu0 %v1265_v23 }
 0x171   : > { %1170 = vmatprep.subr.bf16.mxu0 %v1386_v9 }
 0x174   : > { %1171 = vmatpush3.bf16.msra.mxu0 %v1266_v24 }
 0x175   : > { %1188 = vmatprep.subr.bf16.mxu0 %v1386_v9 }
 0x177   : > { %1173 = vmatmul.mubr.msk.bf16.vlgmr.msra.gmra.mxu0 %vm406_vm0, %v428_v22 }
 0x178   : > { %1190 = vmatprep.mubr.msk.bf16.mxu0 %vm1387_vm1, %v1386_v9 }
 0x22b   : > { %v1614_v25 = vpop.f32.mrf.mxu0  ;;  %v542_v26 = vpop.f32.mrf.mxu1 }
 0x22c   : > { %v621_v27 = vmul.f32 %v542_v26, %v542_v26  ;;  %v606_v32 = vmul.f32 %v1614_v25, %v1614_v25 }
 0x22d   : > { %v1154_v28 = vpop.f32.mrf.mxu0  ;;  %v1164_v29 = vpop.f32.mrf.mxu1 }
 0x22e   : > { %781 = vrot.lane.b32.xlu1 %v621_v27, %s1388_s18  ;;  %v608_v43 = vsel %vm607_vm2, %v606_v32, 0.0  ;;  %v622_v46 = vsel %vm607_vm2, %v621_v27, 0.0 }
 0x22f   : > { %v487_v30 = vpop.f32.mrf.mxu0  ;;  %v545_v31 = vpop.f32.mrf.mxu1 }
 0x231   : > { %v1155_v33 = vpop.f32.mrf.mxu0  ;;  %v1165_v34 = vpop.f32.mrf.mxu1 }
 0x232   : > { %767 = vrot.lane.b32.xlu1 %v606_v32, %s1388_s18 }
 0x237   : > { %v600_v35 = vpop.f32.mrf.mxu0 }
 0x238   : > { %v710_v14 = vpack.c.bf16 %v600_v35, %v600_v35 }
 0x239   : > { %v1174_v36 = vpop.f32.mrf.mxu0 }
 0x23a   : > { %v723_v16 = vsel %vm721_vm3, %v710_v14, 0 }
 0x23b   : > { %v603_v37 = vpop.f32.mrf.mxu0 }
 0x23d   : > { %v1175_v38 = vpop.f32.mrf.mxu0 }
 0x2a0   : > { %v782_v39 = vpop.permute.xlu1 %781 }
 0x2a1   : > { %v784_v40 = vsel %vm607_vm2, %v782_v39, 0.0 }
 0x2a2   : > { %785 = vadd.xlane.f32.xlu0 %v784_v40 }
 0x2a4   : > { %v768_v41 = vpop.permute.xlu1 %767 }
 0x2a5   : > { %v770_v42 = vsel %vm607_vm2, %v768_v41, 0.0 }
 0x2a6   : > { %771 = vadd.xlane.f32.xlu1 %v770_v42 }
 0x2aa   : > { %609 = vadd.xlane.f32.xlu1 %v608_v43 }
 0x2b8   : > { %790 = vrot.lane.b32.xlu0 %v1107_v44, %s1389_s21 }
 0x2bc   : > { %776 = vrot.lane.b32.xlu0 %v1106_v45, %s1389_s21 }
 0x2db   : > { %623 = vadd.xlane.f32.xlu0 %v622_v46 }
 0x2f1   : > { %853 = vrot.lane.b32.xlu0 %v1113_v47, %s1389_s21 }
 0x32b   : > { %v786_v48 = vpop.xlane.xlu0 %785 }
 0x32c   : > { %v787_v49 = vmax.f32 %v786_v48, 1e-24 }
 0x32e   : > { %1271 = vrsqrt.f32 %v787_v49 }
 0x32f   : > { %v772_v50 = vpop.xlane.xlu1 %771  ;;  %v791_v52 = vpop.permute.xlu0 %790 }
 0x330   : > { %v773_v51 = vmax.f32 %v772_v50, 1e-24 }
 0x332   : > { %1273 = vrsqrt.f32 %v773_v51 }
 0x333   : > { %v777_v57 = vpop.permute.xlu0 %776  ;;  %v610_v62 = vpop.xlane.xlu1 %609 }
 0x334   : > { %v611_v1 = vmax.f32 %v610_v62, 1e-24 }
 0x33b   : > { %v1272_v53 = vpop.eup %1271 }
 0x33c   : > { %v789_v54 = vmul.f32 %v1272_v53, %v542_v26 }
 0x33e   : > { %v793_v55 = vmul.f32 %v791_v52, %v789_v54  ;;  %v1267_v54 = vld [vmem:[%s1743_s9 + $0x8] sm:$0xff]  }
 0x33f   : > { %v1274_v56 = vpop.eup %1273 }
 0x340   : > { %v795_v58 = vpack.c.bf16 %v793_v55, %v793_v55  ;;  %v775_v59 = vmul.f32 %v1274_v56, %v1614_v25 }
 0x342   : > { %v779_v60 = vmul.f32 %v777_v57, %v775_v59  ;;  %800 = vrot.lane.b32.xlu1 %v795_v58, %s1388_s18  ;;  %v1110_v58 = vld [vmem:[%s1740_s6] ss:$0 sm:$0xff] }
 0x344   : > { %v794_v61 = vpack.c.bf16 %v779_v60, %v779_v60 }
 0x346   : > { %797 = vrot.lane.b32.xlu1 %v794_v61, %s1388_s18 }
 0x364   : > { %v624_v63 = vpop.xlane.xlu0 %623 }
 0x365   : > { %v625_v2 = vmax.f32 %v624_v63, 1e-24 }
 0x367   : > { %1275 = vrsqrt.f32 %v625_v2 }
 0x368   : > { %v854_v3 = vpop.permute.xlu0 %853  ;;  %1277 = vrsqrt.f32 %v611_v1 }
 0x369   : > { %v856_v4 = vmul.f32 %v854_v3, %v779_v60 }
 0x36b   : > { %858 = vrot.lane.b32.xlu1 %v856_v4, %s1388_s18 }
 0x374   : > { %v1276_v5 = vpop.eup %1275 }
 0x375   : > { %v627_v6 = vmul.f32 %v1276_v5, %v542_v26  ;;  %v1278_v7 = vpop.eup %1277 }
 0x376   : > { %v613_v10 = vmul.f32 %v1278_v7, %v1614_v25 }
 0x377   : > { %v634_v8 = vmul.f32 %v1107_v44, %v627_v6 }
 0x378   : > { %v620_v13 = vmul.f32 %v1106_v45, %v613_v10  ;;  %v1268_v10 = vld [vmem:[%s1743_s9] sm:$0xff]  }
 0x379   : > { %v636_v11 = vpack.c.bf16 %v634_v8, %v634_v8 }
 0x37a   : > { %v635_v15 = vpack.c.bf16 %v620_v13, %v620_v13  ;;  %v689_v18 = vmul.f32 %v1109_v17, %v620_v13 }
 0x37b   : > { %v641_v12 = vsel %vm607_vm2, %v636_v11, 0  ;;  %v1114_v11 = vld [vmem:[%s1740_s6 + $0x1] ss:$0 sm:$0xff] }
 0x37c   : > { %1177 = vmatpush3.bf16.xpose.msra.mxu1 %v641_v12  ;;  %v690_v19 = vsel %vm607_vm2, %v689_v18, 0.0 }
 0x37d   : > { %1182 = vmatprep.subr.bf16.mxu1 %v1386_v9 }
 0x383   : > { %1179 = vmatmul.mubr.msk.bf16.vlgmr.msra.gmra.mxu1 %vm607_vm2, %v635_v15 }
 0x384   : > { %1183 = vmatpush3.bf16.msra.mxu1 %v723_v16  ;;  %1184 = vmatprep.mubr.msk.bf16.mxu1 %vm1387_vm1, %v1386_v9 }
 0x385   : > { %1194 = vmatprep.subr.bf16.mxu1 %v1386_v9 }
 0x38f   : > { %691 = vadd.xlane.f32.xlu1 %v690_v19 }
 0x3b4   : > { %v801_v20 = vpop.permute.xlu1 %800 }
 0x3b5   : > { %v806_v21 = vsel %vm607_vm2, %v801_v20, 0 }
 0x3b6   : > { %1189 = vmatpush3.bf16.xpose.msra.mxu0 %v806_v21 }
 0x3b7   : > { %1200 = vmatprep.subr.bf16.mxu0 %v1386_v9 }
 0x3b8   : > { %v798_v22 = vpop.permute.xlu1 %797 }
 0x3bd   : > { %1191 = vmatmul.mubr.msk.bf16.vlgmr.msra.gmra.mxu0 %vm607_vm2, %v798_v22 }
 0x3be   : > { %1204 = vmatprep.mubr.msk.bf16.mxu0 %vm1387_vm1, %v1386_v9  ;;  %1201 = vmatpush3.bf16.msra.mxu0 %v1267_v54 }
 0x3bf   : > { %1202 = vmatprep.subr.bf16.mxu0 %v1386_v9 }
 0x3c2   : > { %1203 = vmatpush3.bf16.msra.mxu0 %v1268_v10 }
 0x3dd   : > { %v859_v23 = vpop.permute.xlu1 %858 }
 0x3de   : > { %v861_v24 = vsel %vm607_vm2, %v859_v23, 0.0 }
 0x3df   : > { %862 = vadd.xlane.f32.xlu1 %v861_v24 }
 0x418   : > { %v692_v35 = vpop.xlane.xlu1 %691 }
 0x443   : > { %v677_v25 = vpop.f32.mrf.mxu1 }
 0x444   : > { %v694_v26 = vsel %vm693_vm4, %v677_v25, -inf }
 0x445   : > { %695 = vmax.xlane.f32.xlu0 %v694_v26  ;;  %v1180_v27 = vpop.f32.mrf.mxu1 }
 0x447   : > { %v680_v28 = vpop.f32.mrf.mxu1 }
 0x449   : > { %v1181_v29 = vpop.f32.mrf.mxu1 }
 0x468   : > { %v863_v42 = vpop.xlane.xlu1 %862 }
 0x47d   : > { %v842_v30 = vpop.f32.mrf.mxu0 }
 0x47e   : > { %v864_v31 = vsel %vm693_vm4, %v842_v30, -inf }
 0x47f   : > { %865 = vmax.xlane.f32.xlu1 %v864_v31  ;;  %v1192_v32 = vpop.f32.mrf.mxu0 }
 0x481   : > { %v845_v33 = vpop.f32.mrf.mxu0 }
 0x483   : > { %v1193_v34 = vpop.f32.mrf.mxu0 }
 0x490   : > { %888 = vrot.lane.b32.xlu1 %v710_v14, %s1388_s18  ;;  %s1390_s18 = smov [#allocation5]  }
 0x491   : > { %s1323_s28 = sshll.u32 %s1390_s18, 4  ;;  %s1324_s28 = int_to_ptr.vmem [resolvable:$false] %s1323_s28 }
 0x492   : > { %s1325_s29 = scalar_lea.vmem %s1324_s28, 256  ;;  %p1326_p3 = scmp.lt.s32.totalorder %s1692_s30, %s1324_s28 }
 0x493   : > { %p1327_p5 = scmp.lt.s32.totalorder %s1325_s29, %s1319_s19 }
 0x495   : > { %p1328_p8 = por %p1327_p5, %p1326_p3 }
 0x497   : > { %p1329_p10 = pnand %p1328_p8, %p1322_p1 }
 0x4ce   : > { %v696_v36 = vpop.xlane.xlu0 %695 }
 0x4cf   : > { %v697_v37 = vmax.f32 %v696_v36, %v692_v35 }
 0x4d1   : > { %v698_v38 = vsub.f32 %v677_v25, %v697_v37  ;;  %v701_v55 = vsub.f32 %v692_v35, %v697_v37 }
 0x4d3   : > { %v699_v39 = vmul.f32 1.442695, %v698_v38  ;;  %v702_v56 = vmul.f32 1.442695, %v701_v55 }
 0x4d5   : > { %1279 = vpow2.f32 %v699_v39 }
 0x4e2   : > { %v1280_v40 = vpop.eup %1279 }
 0x4e3   : > { %v709_v41 = vpack.c.bf16 %v1280_v40, %v1280_v40  ;;  %v704_v53 = vsel %vm693_vm4, %v1280_v40, 0.0 }
 0x4e5   : > { %1185 = vmatmul.mubr.msk.bf16.vlgmr.msra.gmra.mxu1 %vm693_vm4, %v709_v41 }
 0x4e6   : > { %1196 = vmatprep.mubr.msk.bf16.mxu1 %vm1387_vm1, %v1386_v9 }
 0x508   : > { %v866_v43 = vpop.xlane.xlu1 %865 }
 0x509   : > { %v867_v44 = vmax.f32 %v866_v43, %v863_v42 }
 0x50b   : > { %v868_v45 = vsub.f32 %v842_v30, %v867_v44  ;;  %v871_v46 = vsub.f32 %v863_v42, %v867_v44 }
 0x50c   : > { %v889_v47 = vpop.permute.xlu1 %888 }
 0x50d   : > { %v869_v48 = vmul.f32 1.442695, %v868_v45  ;;  %v894_v49 = vsel %vm721_vm3, %v889_v47, 0  ;;  %v872_v6 = vmul.f32 1.442695, %v871_v46 }
 0x50e   : > { %1195 = vmatpush3.bf16.msra.mxu1 %v894_v49 }
 0x50f   : > { %1281 = vpow2.f32 %v869_v48 }
 0x510   : > { %1283 = vpow2.f32 %v702_v56 }
 0x51c   : > { %v1282_v50 = vpop.eup %1281 }
 0x51d   : > { %v874_v51 = vsel %vm693_vm4, %v1282_v50, 0.0  ;;  %v879_v52 = vpack.c.bf16 %v1282_v50, %v1282_v50  ;;  %v1284_v57 = vpop.eup %1283 }
 0x51e   : > { %875 = vadd.xlane.f32.xlu0 %v874_v51  ;;  %v717_v59 = vmul.f32 %v1284_v57, %v1110_v58 }
 0x51f   : > { %1197 = vmatmul.mubr.msk.bf16.vlgmr.msra.gmra.mxu1 %vm693_vm4, %v879_v52 }
 0x522   : > { %705 = vadd.xlane.f32.xlu0 %v704_v53 }
 0x5a5   : > { %v759_v60 = vpop.f32.mrf.mxu1 }
 0x5a6   : > { %v760_v61 = vadd.f32 %v759_v60, %v717_v59 }
 0x5a7   : > { %v1186_v62 = vpop.f32.mrf.mxu1  ;;  %v876_v63 = vpop.xlane.xlu0 %875 }
 0x5a9   : > { %v762_v1 = vpop.f32.mrf.mxu1 }
 0x5ab   : > { %v1187_v2 = vpop.f32.mrf.mxu1  ;;  %v706_v3 = vpop.xlane.xlu0 %705 }
 0x5ac   : > { %v707_v4 = vadd.f32 %v1284_v57, %v706_v3 }
 0x5ae   : > { %1285 = vrcp.f32 %v707_v4 }
 0x5af   : > { %1287 = vpow2.f32 %v872_v6 }
 0x5bb   : > { %v1286_v5 = vpop.eup %1285 }
 0x5bc   : > { %v765_v9 = vmul.f32 %v1286_v5, %v760_v61  ;;  %v1288_v7 = vpop.eup %1287 }
 0x5bd   : > { %v877_v8 = vadd.f32 %v1288_v7, %v876_v63  ;;  %v886_v12 = vmul.f32 %v1288_v7, %v1114_v11 }
 0x5bf   : > { %1289 = vrcp.f32 %v877_v8 }
 0x5cc   : > { %v1290_v15 = vpop.eup %1289 }
 0x5df   : > { %v930_v13 = vpop.f32.mrf.mxu1 }
 0x5e0   : > { %v931_v14 = vadd.f32 %v930_v13, %v886_v12 }
 0x5e1   : > { %v1198_v16 = vpop.f32.mrf.mxu1 }
 0x5e2   : > { %v936_v17 = vmul.f32 %v1290_v15, %v931_v14 }
 0x5e3   : > { %v933_v18 = vpop.f32.mrf.mxu1 }
 0x5e4   : > { %938 = vrot.lane.b32.xlu0 %v936_v17, %s1389_s21  ;;  %s1690_s21 = scalar_lea.hbm %s1744_s10, %s1120_s20 }
 0x5e5   : > { %v1199_v19 = vpop.f32.mrf.mxu1 }
 0x656   : > { %v939_v20 = vpop.permute.xlu0 %938 }
 0x657   : > { %v941_v21 = vsel %vm607_vm2, %v765_v9, %v939_v20 }
 0x658   : > { %v942_v22 = vpack.c.bf16 %v941_v21, %v941_v21 }
 0x65a   : > { %1205 = vmatmul.mubr.msk.bf16.vlgmr.msra.gmra.mxu0 %vm955_vm5, %v942_v22 }
 0x71a   : > { %v993_v23 = vpop.f32.mrf.mxu0 }
 0x71b   : > { %v999_v24 = vadd.f32 %v993_v23, %v1554_v0 }
 0x71c   : > { %v1206_v25 = vpop.f32.mrf.mxu0 }
 0x71d   : > { %1000 = vst.msk [vmem:[%s374_s23] sm:$0xff] %vm406_vm0, %v999_v24 }
 0x71e   : > { %v996_v26 = vpop.f32.mrf.mxu0 }
 0x71f   : > { %1332 = shalt.err (!%p1329_p10)
}
 0x720   : > { %s1333_s22 = scalar_lea.hbm %s1690_s21, 128  ;;  %s1337_s24 = scalar_lea.hbm %s1744_s10, 256 }
 0x721   : > { %p1334_p2 = scmp.ne.s32.totalorder %s1690_s21, %s1333_s22  ;;  %p1338_p7 = scmp.lt.s32.totalorder %s1690_s21, %s1744_s10 }
 0x722   : > { %p1339_p0 = scmp.lt.s32.totalorder %s1337_s24, %s1333_s22 }
 0x723   : > { %p1335_p4 = pnand %p1334_p2, %p1761_p12 }
 0x724   : > { %p1340_p6 = por %p1339_p0, %p1338_p7 }
 0x725   : > { %p1336_p9 = pneg %p1335_p4 }
 0x727   : > { %p1341_p11 = pnand %p1340_p6, %p1336_p9 }
 0x729   : > { %1344 = shalt.err (!%p1341_p11)
}
 0x72a   : > { %1210 = dma.vmem_to_hbm [thread:$0]  (%p1761_p12), %s1692_s30, 128, %s1690_s21, %s1002_s17   ;;  %v1207_v0 = vpop.f32.mrf.mxu0 }
 0x72b PF: > { %s1027_s11 = sand.u32 1, %s1371_s13   ;;  %p1762_p13 = scmp.ne.s32.totalorder %s1756_s26, 0 }
 0x72c   : > { %p1763_p1 = scmp.ge.s32.totalorder %s1383_s16, 2  ;;  %s1028_s27 = scalar_lea.sflag [#allocation4], %s1027_s11 }
 0x72e   : > { %p1217_p3 = pnand %p1763_p1, %p1762_p13 }
 0x730   : > { %p1218_p5 = pneg %p1217_p3 }
 0x732   : > { %1366 = dma.done.wait (%p1218_p5), %s1028_s27, 128  }
 0x733   : > { %1368 = vsyncadd (%p1218_p5), %s1028_s27, 4294967168  ;;  %s1764_s16 = sld [smem:[#allocation9_spill]]  ;;  %s1767_s13 = smov %s1375_s14 }
 0x734   : > { %s1765_s19 = sld [smem:[#allocation8_spill]] }
 0x735   : > { %s1766_s15 = sld [smem:[#allocation10_spill]] }
 0x739   : > { %p23_p8 = scmp.ge.s32.totalorder %s1764_s16, 4  }
 0x73a   : > { %s1768_s14 = smov %s1765_s19 }
 0x73b   :  { %25 = sbr.rel (!%p23_p8) target bundleno = 5 (0x5), region = 105 }
 0x740   :  { %1033 = vsyncpa [#allocation3], 1 }
 0x741   :  { %1035 = vsyncpa [#allocation3 + $0x1], 1 }
 0x742   :  { %1036 = vsyncpa [#allocation4], 1 }
 0x743   :  { %1038 = vsyncpa [#allocation4 + $0x1], 1 }

</bundles_post_ra>
